<compile_context>
chip_gen: v7x
topology: tpu7x:2x2x1
jax: 0.10.0
libtpu: 0.0.40
codegen_flags: <defaults>
</compile_context>

<pallas_src>
import functools

import jax
import jax.numpy as jnp
from jax.experimental import pallas as pl
from jax.experimental.pallas import tpu as pltpu

_EPS = 1e-12                 # matches torch.nn.functional.normalize default eps
_EPS2 = _EPS * _EPS          # compare sums-of-squares against eps^2
_MAX_TB = 64 * 1024          # lanes (batch elements) per block; multiple of 128
_MIN_BLOCKS = 4              # >= 2 blocks per TensorCore on v7x for large B
_FAST_PATH_MAX_B = 16384     # below this, pure-JAX (XLA-fused) path is faster
_VMEM_LIMIT_BYTES = 32 * 1024 * 1024


def _round_up(n, m):
    return ((n + m - 1) // m) * m


def _pose_loss_kernel(x_ref, y_ref, o_ref):
    """x_ref, y_ref: (7, TB) f32 blocks; o_ref: (4, TB) f32 block.

    Output rows (per batch column):
      0: <normalize(quat_x), quat_y>
      1: <normalize(t_x), normalize(t_y)>
      2: | ||quat_x|| - 1 |
      3: | ||t_x||    - 1 |
    """
    x = x_ref[...]
    y = y_ref[...]

    # Static sublane slices: quaternion = rows 0:4, translation = rows 4:7.
    xq, xt = x[0:4, :], x[4:7, :]
    yq, yt = y[0:4, :], y[4:7, :]

    # Per-column reductions over the tiny channel (sublane) axis.
    ssq_q = jnp.sum(xq * xq, axis=0, keepdims=True)     # (1, TB)
    ssq_xt = jnp.sum(xt * xt, axis=0, keepdims=True)    # (1, TB)
    ssq_yt = jnp.sum(yt * yt, axis=0, keepdims=True)    # (1, TB)
    raw_q = jnp.sum(xq * yq, axis=0, keepdims=True)     # (1, TB)
    raw_t = jnp.sum(xt * yt, axis=0, keepdims=True)     # (1, TB)

    # Single rsqrt per norm (EUP); torch F.normalize semantics x / max(||x||, eps)
    # is identical to rsqrt(max(ssq, eps^2)) in f32.
    inv_q = jax.lax.rsqrt(jnp.maximum(ssq_q, _EPS2))
    inv_xt = jax.lax.rsqrt(jnp.maximum(ssq_xt, _EPS2))
    inv_yt = jax.lax.rsqrt(jnp.maximum(ssq_yt, _EPS2))

    q_norm = ssq_q * inv_q       # == ||xq||  (ssq * rsqrt(ssq)), VALU only
    t_norm = ssq_xt * inv_xt     # == ||xt||

    o_ref[0:1, :] = raw_q * inv_q
    o_ref[1:2, :] = raw_t * (inv_xt * inv_yt)
    o_ref[2:3, :] = jnp.abs(q_norm - 1.0)
    o_ref[3:4, :] = jnp.abs(t_norm - 1.0)


def _pose_loss_pallas(x, y, max_tb=_MAX_TB):
    """Pallas path. x, y: (B, 7) float. Returns the 5 PoseLoss outputs."""
    B, C = x.shape
    assert C == 7, "expected 7 pose channels (4 quat + 3 translation)"

    # Single re-layout pass so batch rides the 128-lane axis (no pad pass).
    xT = x.astype(jnp.float32).T   # (7, B)
    yT = y.astype(jnp.float32).T

    if B <= max_tb:
        tb = B                                   # one full block
    else:
        # Multiple-of-128 tile, at least _MIN_BLOCKS blocks, capped at max_tb.
        tb = min(max_tb, _round_up(pl.cdiv(B, _MIN_BLOCKS), 128))
    n_blk = pl.cdiv(B, tb)

    out = pl.pallas_call(
        _pose_loss_kernel,
        out_shape=jax.ShapeDtypeStruct((4, B), jnp.float32),
        grid=(n_blk,),
        in_specs=[
            pl.BlockSpec((7, tb), lambda i: (0, i)),
            pl.BlockSpec((7, tb), lambda i: (0, i)),
        ],
        out_specs=pl.BlockSpec((4, tb), lambda i: (0, i)),
        compiler_params=pltpu.CompilerParams(
            dimension_semantics=("parallel",),
            vmem_limit_bytes=_VMEM_LIMIT_BYTES),
    )(xT, yT)

    qdot, tdot = out[0], out[1]
    qn_err, tn_err = out[2], out[3]

    # Tiny epilogue: arccos (no guaranteed Mosaic lowering) + four batch means.
    quat_norm_loss = jnp.mean(qn_err)
    transl_norm_loss = jnp.mean(tn_err)
    orientation_loss = jnp.mean(
        2.0 * jnp.arccos(jnp.clip(jnp.abs(qdot), 0.0, 1.0)))
    translation_direction_loss = jnp.mean(
        jnp.arccos(jnp.clip(tdot, -1.0, 1.0)))

    loss = (orientation_loss + translation_direction_loss
            + 0.5 * quat_norm_loss + 0.5 * transl_norm_loss)
    return [loss, orientation_loss, translation_direction_loss,
            quat_norm_loss, transl_norm_loss]


def _pose_loss_ref(x, y):
    """Pure-JAX reference mirroring the PyTorch forward (same assumed pose_algebra)."""
    x = x.astype(jnp.float32)
    y = y.astype(jnp.float32)
    xq, xt = x[:, 0:4], x[:, 4:7]
    yq, yt = y[:, 0:4], y[:, 4:7]
    qn = jnp.linalg.norm(xq, axis=1)
    q_loss = jnp.mean(jnp.abs(qn - 1.0))
    xq_n = xq / jnp.maximum(qn[:, None], _EPS)
    orient = jnp.mean(2.0 * jnp.arccos(
        jnp.clip(jnp.abs(jnp.sum(xq_n * yq, axis=1)), 0.0, 1.0)))
    tn = jnp.linalg.norm(xt, axis=1)
    t_loss = jnp.mean(jnp.abs(tn - 1.0))
    xt_n = xt / jnp.maximum(tn[:, None], _EPS)
    yt_n = yt / jnp.maximum(jnp.linalg.norm(yt, axis=1, keepdims=True), _EPS)
    t_dir = jnp.mean(jnp.arccos(
        jnp.clip(jnp.sum(xt_n * yt_n, axis=1), -1.0, 1.0)))
    total = orient + t_dir + 0.5 * q_loss + 0.5 * t_loss
    return [total, orient, t_dir, q_loss, t_loss]


def _pose_loss_dispatch(x, y):
    # Small batches: one XLA-fused pass beats transpose + pallas launch + epilogue.
    if x.shape[0] <= _FAST_PATH_MAX_B:
        return _pose_loss_ref(x, y)
    return _pose_loss_pallas(x, y)


pose_loss = jax.jit(_pose_loss_dispatch)


def _make_inputs(key, batch):
    kx, ky_q, ky_t = jax.random.split(key, 3)
    x = jax.random.normal(kx, (batch, 7), dtype=jnp.float32)
    yq = jax.random.normal(ky_q, (batch, 4), dtype=jnp.float32)
    yq = yq / jnp.linalg.norm(yq, axis=1, keepdims=True)   # GT quats unit-norm
    yt = jax.random.normal(ky_t, (batch, 3), dtype=jnp.float32)
    y = jnp.concatenate([yq, yt], axis=1)
    return x, y


def _check(got, want, tag):
    for g, w in zip(got, want):
        assert jnp.allclose(g, w, atol=1e-4, rtol=1e-4), (tag, g, w)


if __name__ == "__main__":
    key = jax.random.PRNGKey(0)
    k1, k2, k3 = jax.random.split(key, 3)

    # 1) Tiny single-block case through the Pallas path (B = 8 < tb).
    x1, y1 = _make_inputs(k1, 8)
    out1 = jax.jit(_pose_loss_pallas)(x1, y1)
    out1 = [jax.block_until_ready(o) for o in out1]
    _check(out1, _pose_loss_ref(x1, y1), "single-block")

    # 2) Multi-block case with a partial last block (B=300, tb=128 -> 3 blocks),
    #    exercising the grid + non-divisible-last-block path at small size.
    x2, y2 = _make_inputs(k2, 300)
    out2 = jax.jit(functools.partial(_pose_loss_pallas, max_tb=128))(x2, y2)
    out2 = [jax.block_until_ready(o) for o in out2]
    _check(out2, _pose_loss_ref(x2, y2), "multi-block")

    # 3) Public entry point (small-B fast path dispatch).
    x3, y3 = _make_inputs(k3, 64)
    out3 = pose_loss(x3, y3)
    out3 = [jax.block_until_ready(o) for o in out3]
    _check(out3, _pose_loss_ref(x3, y3), "dispatcher")

    print("KERNEL_OK")
</pallas_src>

<mosaic_0001>
module attributes {stable_mosaic.version = 11 : i64} {
  func.func @_pose_loss_kernel(%arg0: i32, %arg1: memref<7x8xf32, #tpu.memory_space<vmem>>, %arg2: memref<7x8xf32, #tpu.memory_space<vmem>>, %arg3: memref<4x8xf32, #tpu.memory_space<vmem>>) attributes {dimension_semantics = [#tpu.dimension_semantics<parallel>], iteration_bounds = array<i64: 1>, scalar_prefetch = 0 : i64, scratch_operands = 0 : i64, tpu.core_type = #tpu.core_type<tc>, window_params = [{transform_indices = @transform_0, window_bounds = array<i64: 7, 8>}, {transform_indices = @transform_1, window_bounds = array<i64: 7, 8>}, {transform_indices = @transform_2, window_bounds = array<i64: 4, 8>}]} {
    %c0 = arith.constant 0 : index
    %c0_0 = arith.constant 0 : index
    %0 = vector.load %arg1[%c0, %c0_0] : memref<7x8xf32, #tpu.memory_space<vmem>>, vector<7x8xf32>
    %c0_1 = arith.constant 0 : index
    %c0_2 = arith.constant 0 : index
    %1 = vector.load %arg2[%c0_1, %c0_2] : memref<7x8xf32, #tpu.memory_space<vmem>>, vector<7x8xf32>
    %2 = vector.extract_strided_slice %0 {offsets = [0, 0], sizes = [4, 8], strides = [1, 1]} : vector<7x8xf32> to vector<4x8xf32>
    %3 = vector.extract_strided_slice %0 {offsets = [4, 0], sizes = [3, 8], strides = [1, 1]} : vector<7x8xf32> to vector<3x8xf32>
    %4 = vector.extract_strided_slice %1 {offsets = [0, 0], sizes = [4, 8], strides = [1, 1]} : vector<7x8xf32> to vector<4x8xf32>
    %5 = vector.extract_strided_slice %1 {offsets = [4, 0], sizes = [3, 8], strides = [1, 1]} : vector<7x8xf32> to vector<3x8xf32>
    %6 = arith.mulf %2, %2 : vector<4x8xf32>
    %cst = arith.constant dense<0.000000e+00> : vector<8xf32>
    %7 = vector.multi_reduction <add>, %6, %cst [0] : vector<4x8xf32> to vector<8xf32>
    %8 = vector.shape_cast %7 : vector<8xf32> to vector<1x8xf32>
    %9 = arith.mulf %3, %3 : vector<3x8xf32>
    %cst_3 = arith.constant dense<0.000000e+00> : vector<8xf32>
    %10 = vector.multi_reduction <add>, %9, %cst_3 [0] : vector<3x8xf32> to vector<8xf32>
    %11 = vector.shape_cast %10 : vector<8xf32> to vector<1x8xf32>
    %12 = arith.mulf %5, %5 : vector<3x8xf32>
    %cst_4 = arith.constant dense<0.000000e+00> : vector<8xf32>
    %13 = vector.multi_reduction <add>, %12, %cst_4 [0] : vector<3x8xf32> to vector<8xf32>
    %14 = vector.shape_cast %13 : vector<8xf32> to vector<1x8xf32>
    %15 = arith.mulf %2, %4 : vector<4x8xf32>
    %cst_5 = arith.constant dense<0.000000e+00> : vector<8xf32>
    %16 = vector.multi_reduction <add>, %15, %cst_5 [0] : vector<4x8xf32> to vector<8xf32>
    %17 = vector.shape_cast %16 : vector<8xf32> to vector<1x8xf32>
    %18 = arith.mulf %3, %5 : vector<3x8xf32>
    %cst_6 = arith.constant dense<0.000000e+00> : vector<8xf32>
    %19 = vector.multi_reduction <add>, %18, %cst_6 [0] : vector<3x8xf32> to vector<8xf32>
    %20 = vector.shape_cast %19 : vector<8xf32> to vector<1x8xf32>
    %cst_7 = arith.constant 1.000000e-24 : f32
    %21 = vector.broadcast %cst_7 : f32 to vector<1x8xf32>
    %22 = arith.maximumf %8, %21 : vector<1x8xf32>
    %23 = math.rsqrt %22 : vector<1x8xf32>
    %cst_8 = arith.constant 1.000000e-24 : f32
    %24 = vector.broadcast %cst_8 : f32 to vector<1x8xf32>
    %25 = arith.maximumf %11, %24 : vector<1x8xf32>
    %26 = math.rsqrt %25 : vector<1x8xf32>
    %cst_9 = arith.constant 1.000000e-24 : f32
    %27 = vector.broadcast %cst_9 : f32 to vector<1x8xf32>
    %28 = arith.maximumf %14, %27 : vector<1x8xf32>
    %29 = math.rsqrt %28 : vector<1x8xf32>
    %30 = arith.mulf %8, %23 : vector<1x8xf32>
    %31 = arith.mulf %11, %26 : vector<1x8xf32>
    %32 = arith.mulf %17, %23 : vector<1x8xf32>
    %c0_10 = arith.constant 0 : index
    %c0_11 = arith.constant 0 : index
    %33 = vector.load %arg3[%c0_10, %c0_11] : memref<4x8xf32, #tpu.memory_space<vmem>>, vector<1x8xf32>
    tpu.vector_store %arg3[%c0_10, %c0_11], %32 {strides = array<i32>} : memref<4x8xf32, #tpu.memory_space<vmem>>, vector<1x8xf32>,
    %34 = arith.mulf %26, %29 : vector<1x8xf32>
    %35 = arith.mulf %20, %34 : vector<1x8xf32>
    %c1 = arith.constant 1 : index
    %c0_12 = arith.constant 0 : index
    %36 = vector.load %arg3[%c1, %c0_12] : memref<4x8xf32, #tpu.memory_space<vmem>>, vector<1x8xf32>
    tpu.vector_store %arg3[%c1, %c0_12], %35 {strides = array<i32>} : memref<4x8xf32, #tpu.memory_space<vmem>>, vector<1x8xf32>,
    %cst_13 = arith.constant 1.000000e+00 : f32
    %37 = vector.broadcast %cst_13 : f32 to vector<1x8xf32>
    %38 = arith.subf %30, %37 : vector<1x8xf32>
    %39 = math.absf %38 : vector<1x8xf32>
    %c2 = arith.constant 2 : index
    %c0_14 = arith.constant 0 : index
    %40 = vector.load %arg3[%c2, %c0_14] : memref<4x8xf32, #tpu.memory_space<vmem>>, vector<1x8xf32>
    tpu.vector_store %arg3[%c2, %c0_14], %39 {strides = array<i32>} : memref<4x8xf32, #tpu.memory_space<vmem>>, vector<1x8xf32>,
    %cst_15 = arith.constant 1.000000e+00 : f32
    %41 = vector.broadcast %cst_15 : f32 to vector<1x8xf32>
    %42 = arith.subf %31, %41 : vector<1x8xf32>
    %43 = math.absf %42 : vector<1x8xf32>
    %c3 = arith.constant 3 : index
    %c0_16 = arith.constant 0 : index
    %44 = vector.load %arg3[%c3, %c0_16] : memref<4x8xf32, #tpu.memory_space<vmem>>, vector<1x8xf32>
    tpu.vector_store %arg3[%c3, %c0_16], %43 {strides = array<i32>} : memref<4x8xf32, #tpu.memory_space<vmem>>, vector<1x8xf32>,
    return
  }
  func.func @transform_0(%arg0: i32) -> (i32, i32) {
    %c0_i32 = arith.constant 0 : i32
    %c0_i32_0 = arith.constant 0 : i32
    return %c0_i32, %arg0 : i32, i32
  }
  func.func @transform_1(%arg0: i32) -> (i32, i32) {
    %c0_i32 = arith.constant 0 : i32
    %c0_i32_0 = arith.constant 0 : i32
    return %c0_i32, %arg0 : i32, i32
  }
  func.func @transform_2(%arg0: i32) -> (i32, i32) {
    %c0_i32 = arith.constant 0 : i32
    %c0_i32_0 = arith.constant 0 : i32
    return %c0_i32, %arg0 : i32, i32
  }
}

</mosaic_0001>

<bundles_post_ra>
// kernel: _pose_loss_pallas.1
= control target key start
LH: loop header
LB: loop body
LE: loop exit
PB: predicated region body
PF: predicated region fallthrough
CT: control target
= control target key end

     0   :  { %vm14_vm0 = vcmask 60416   ;;  %vm25_vm1 = vcmask 59392   ;;  %vm71_vm2 = vcmask 57344   ;;  %s131_s0 = inlined_call_operand.vmem [shape: f32[7,8], index: 0, kind: input, shape index: {}]   ;;  %s132_s1 = inlined_call_operand.vmem [shape: f32[7,8], index: 1, kind: input, shape index: {}]   ;;  %s133_s2 = inlined_call_operand.vmem [shape: f32[4,8], index: 2, kind: output, shape index: {}]  }
   0x1   :  { %v11_v0 = vld [vmem:[%s131_s0] sm:$0x7f] }
   0x2   :  { %v12_v1 = vld [vmem:[%s132_s1] sm:$0x7f]  ;;  %v13_v2 = vmul.f32 %v11_v0, %v11_v0 }
   0x3   :  { %v33_v3 = vmul.f32 %v12_v1, %v12_v1  ;;  %v44_v4 = vmul.f32 %v12_v1, %v11_v0 }
   0x4   :  { %v15_v5 = vsel %vm14_vm0, %v13_v2, 0.0  ;;  %v23_v6 = vrot.slane %v13_v2, 4 }
   0x5   :  { %v35_v7 = vrot.slane %v33_v3, 4  ;;  %v45_v8 = vsel %vm14_vm0, %v44_v4, 0.0  ;;  %v16_v9 = vrot.slane %v15_v5, 4  ;;  %v53_v10 = vrot.slane %v44_v4, 4 }
   0x6   :  { %v46_v11 = vrot.slane %v45_v8, 4  ;;  %v26_v12 = vsel %vm25_vm1, %v23_v6, 0.0 }
   0x7   :  { %v37_v13 = vsel %vm25_vm1, %v35_v7, 0.0  ;;  %v17_v14 = vadd.f32 %v16_v9, %v15_v5  ;;  %v27_v15 = vrot.slane %v26_v12, 4  ;;  %v55_v17 = vsel %vm25_vm1, %v53_v10, 0.0 }
   0x8   :  { %v38_v16 = vrot.slane %v37_v13, 4  ;;  %v47_v21 = vadd.f32 %v46_v11, %v45_v8  ;;  %v56_v25 = vrot.slane %v55_v17, 4 }
   0x9   :  { %v18_v18 = vrot.slane %v17_v14, 2  ;;  %v28_v19 = vadd.f32 %v27_v15, %v26_v12 }
   0xa   :  { %v39_v20 = vadd.f32 %v38_v16, %v37_v13  ;;  %v48_v29 = vrot.slane %v47_v21, 2  ;;  %v57_v33 = vadd.f32 %v56_v25, %v55_v17 }
   0xb   :  { %v19_v22 = vadd.f32 %v18_v18, %v17_v14  ;;  %v29_v23 = vrot.slane %v28_v19, 2 }
   0xc   :  { %v40_v24 = vrot.slane %v39_v20, 2  ;;  %v49_v37 = vadd.f32 %v48_v29, %v47_v21  ;;  %v58_v38 = vrot.slane %v57_v33, 2 }
   0xd   :  { %v20_v26 = vrot.slane %v19_v22, 1  ;;  %v30_v27 = vadd.f32 %v29_v23, %v28_v19 }
   0xe   :  { %v41_v28 = vadd.f32 %v40_v24, %v39_v20  ;;  %v50_v41 = vrot.slane %v49_v37, 1  ;;  %v59_v42 = vadd.f32 %v58_v38, %v57_v33 }
   0xf   :  { %v21_v30 = vadd.f32 %v20_v26, %v19_v22  ;;  %v31_v31 = vrot.slane %v30_v27, 1 }
  0x10   :  { %v42_v32 = vrot.slane %v41_v28, 1  ;;  %v51_v43 = vadd.f32 %v50_v41, %v49_v37  ;;  %v60_v44 = vrot.slane %v59_v42, 1 }
  0x11   :  { %v62_v34 = vmax.f32 %v21_v30, 1e-24  ;;  %v32_v35 = vadd.f32 %v31_v31, %v30_v27 }
  0x12   :  { %v43_v36 = vadd.f32 %v42_v32, %v41_v28  ;;  %v61_v49 = vadd.f32 %v60_v44, %v59_v42 }
  0x13   :  { %88 = vrsqrt.f32 %v62_v34  ;;  %v64_v39 = vmax.f32 %v32_v35, 1e-24 }
  0x14   :  { %v66_v40 = vmax.f32 %v43_v36, 1e-24 }
  0x15   :  { %90 = vrsqrt.f32 %v64_v39 }
  0x16   :  { %92 = vrsqrt.f32 %v66_v40 }
  0x1d   :  { %v89_v45 = vpop.eup %88 }
  0x1e   :  { %v70_v46 = vmul.f32 %v89_v45, %v51_v43  ;;  %v68_v47 = vmul.f32 %v89_v45, %v21_v30 }
  0x1f   :  { %v91_v48 = vpop.eup %90 }
  0x20   :  { %v93_v50 = vpop.eup %92  ;;  %72 = vst.msk [vmem:[%s133_s2] sm:$0x1] %vm71_vm2, %v70_v46  ;;  %v86_v51 = vadd.f32 -1.0, %v68_v47  ;;  %v69_v52 = vmul.f32 %v91_v48, %v32_v35 }
  0x21   :  { %v73_v53 = vmul.f32 %v93_v50, %v91_v48 }
  0x22   :  { %v77_v54 = vand.u32 2147483647, %v86_v51  ;;  %v87_v55 = vadd.f32 -1.0, %v69_v52 }
  0x23   :  { %v74_v56 = vmul.f32 %v73_v53, %v61_v49 }
  0x24   :  { %78 = vst.msk [vmem:[%s133_s2 + $0x2] sm:$0x1] %vm71_vm2, %v77_v54  ;;  %v80_v57 = vand.u32 2147483647, %v87_v55 }
  0x25   :  { %75 = vst.msk [vmem:[%s133_s2 + $0x1] sm:$0x1] %vm71_vm2, %v74_v56 }
  0x26   :  { %81 = vst.msk [vmem:[%s133_s2 + $0x3] sm:$0x1] %vm71_vm2, %v80_v57 }

</bundles_post_ra>
